<compile_context>
chip_gen: v7x
topology: tpu7x:2x2x1
jax: 0.10.0
libtpu: 0.0.40
codegen_flags: <defaults>
</compile_context>

<pallas_src>
import functools

import jax
import jax.numpy as jnp
from jax.experimental import pallas as pl
from jax.experimental.pallas import tpu as pltpu


def _rmsnorm_kernel(x_ref, w_ref, o_ref, *, eps):
    # x_ref: (block_rows, dim), w_ref: (1, dim) f32 (pre-cast), o_ref: (block_rows, dim)
    # Pass 1: per-row mean of squares in f32 (XLU reduction + EUP rsqrt).
    x32 = x_ref[...].astype(jnp.float32)
    ms = jnp.mean(x32 * x32, axis=-1, keepdims=True)
    inv_norm = jax.lax.rsqrt(ms + eps)          # EUP slot — free in a mem-bound kernel
    # Pass 2: reload x (instead of keeping the f32 copy live across the
    # reduction) — extra vld/cast is free VPU/load work here, and it avoids a
    # block_rows*dim*4-byte live intermediate (spill traffic / VMEM pressure).
    x32b = x_ref[...].astype(jnp.float32)
    o_ref[...] = (w_ref[...] * (x32b * inv_norm)).astype(o_ref.dtype)


def _round_up(n, m):
    return ((n + m - 1) // m) * m


def _vmem_capacity_bytes():
    """Generation-aware VMEM capacity (v7x: 64 MiB, v5e/v6e: 128 MiB)."""
    try:
        info = pltpu.get_tpu_info()
        cap = getattr(info, "vmem_capacity_bytes", None)
        if cap:
            return int(cap)
    except Exception:
        pass
    return 64 * 1024 * 1024  # conservative fallback (v7x-sized)


# Target size for the streamed input tile.  Measured streaming kernels reach
# ~85% of HBM roofline at >=1-4 MiB tiles; 8 MiB keeps per-step overhead
# (~0.35 us) negligible even for narrow hidden dims.
_TARGET_IN_TILE_BYTES = 8 * 1024 * 1024
_MAX_BLOCK_ROWS = 8192  # sanity cap on tile height


def rmsnorm(x, weight, eps=1e-5, block_rows=None):
    """RMSNorm over the last axis of x, matching the PyTorch reference.

    x:      (..., dim)   weight: (dim,)
    """
    orig_shape = x.shape
    dim = orig_shape[-1]
    rows = 1
    for s in orig_shape[:-1]:
        rows *= s
    x2d = x.reshape(rows, dim)

    # Hoist weight prep out of the kernel: one (1, dim) f32 array, kept
    # resident across grid steps via a constant index_map (no per-step cast).
    w2d = weight.astype(jnp.float32).reshape(1, dim)

    itemsize = jnp.dtype(x.dtype).itemsize
    # Dtype-aware sublane multiple: 8 rows for 4-byte, 16 for bf16, 32 for 1-byte.
    sublane = max(8, 32 // itemsize)

    # --- VMEM accounting (per grid step) -----------------------------------
    # 2x double-buffered input tile + 2x double-buffered output tile
    #   = 4 * block_rows * dim * itemsize
    # plus in-kernel f32 intermediates (x cast + scaled product, conservatively
    # two f32 tiles) = 8 * block_rows * dim.
    vmem_cap = _vmem_capacity_bytes()
    footprint_budget = min(vmem_cap * 5 // 8, 64 * 1024 * 1024)  # ~40 MiB on v7x, 64 MiB on v5e/v6e
    bytes_per_row_footprint = dim * (4 * itemsize + 8)
    bytes_per_row_in = dim * itemsize

    if block_rows is None:
        rows_by_footprint = footprint_budget // bytes_per_row_footprint
        rows_by_tile_target = _TARGET_IN_TILE_BYTES // bytes_per_row_in
        block_rows = max(sublane,
                         min(_MAX_BLOCK_ROWS, rows_by_footprint, rows_by_tile_target))
    # No taller than needed to cover all rows; keep a sublane multiple.
    block_rows = min(block_rows, _round_up(rows, sublane))
    block_rows = _round_up(block_rows, sublane)

    # Scoped-VMEM limit: enough for the computed footprint plus headroom,
    # never exceeding (physical capacity - 8 MiB).
    footprint = block_rows * bytes_per_row_footprint + 4 * dim
    vmem_limit = min(vmem_cap - 8 * 1024 * 1024,
                     max(32 * 1024 * 1024, footprint + 16 * 1024 * 1024))

    # Ragged last block: Pallas masks out-of-bounds writes, and any garbage in
    # over-read rows cannot contaminate valid rows (all math is row-wise), so
    # no wrapper-side jnp.pad / output slice (saves two full HBM passes).
    grid = (pl.cdiv(rows, block_rows),)

    # Advisory cost estimate so XLA overlaps neighbors with this mem-bound call.
    cost = pl.CostEstimate(
        flops=5 * rows * dim,
        transcendentals=rows,
        bytes_accessed=2 * rows * dim * itemsize + 4 * dim,
    )

    out = pl.pallas_call(
        functools.partial(_rmsnorm_kernel, eps=eps),
        out_shape=jax.ShapeDtypeStruct((rows, dim), x.dtype),
        grid_spec=pltpu.PrefetchScalarGridSpec(
            num_scalar_prefetch=0,
            grid=grid,
            in_specs=[
                pl.BlockSpec((block_rows, dim), lambda i: (i, 0)),  # x tile (streamed)
                pl.BlockSpec((1, dim), lambda i: (0, 0)),           # weight (resident)
            ],
            out_specs=pl.BlockSpec((block_rows, dim), lambda i: (i, 0)),
        ),
        compiler_params=pltpu.CompilerParams(
            # "parallel" lets the runtime shard the row grid across TensorCores
            # (megacore on v5p / 2-TC v7x); rows are fully independent.
            dimension_semantics=("parallel",),
            vmem_limit_bytes=int(vmem_limit),
        ),
        cost_estimate=cost,
    )(x2d, w2d)

    return out.reshape(orig_shape)


if __name__ == "__main__":
    # Small shapes implied by the module: RMSNorm over the hidden dim of a
    # (batch, seq, hidden) activation.
    batch, seq, dim = 2, 8, 32
    key = jax.random.PRNGKey(0)
    x = jax.random.normal(key, (batch, seq, dim), dtype=jnp.float32)

    # Deterministic parameter init matching nn.Parameter(torch.ones(dim)).
    weight = jnp.ones((dim,), dtype=jnp.float32)
    eps = 1e-5

    y = rmsnorm(x, weight, eps=eps)
    y = jax.block_until_ready(y)

    # Pure-JAX reference check of the PyTorch semantics.
    norm = jnp.sqrt(jnp.mean(x * x, axis=-1, keepdims=True) + eps)
    y_ref = weight * (x / norm)
    assert y.shape == x.shape
    assert jnp.allclose(y, y_ref, atol=1e-6, rtol=1e-6)

    print("KERNEL_OK")
</pallas_src>

<mosaic_0001>
module attributes {stable_mosaic.version = 11 : i64} {
  func.func @_rmsnorm_kernel(%arg0: i32, %arg1: memref<16x32xf32, #tpu.memory_space<vmem>>, %arg2: memref<1x32xf32, #tpu.memory_space<vmem>>, %arg3: memref<16x32xf32, #tpu.memory_space<vmem>>) attributes {dimension_semantics = [#tpu.dimension_semantics<parallel>], iteration_bounds = array<i64: 1>, scalar_prefetch = 0 : i64, scratch_operands = 0 : i64, tpu.core_type = #tpu.core_type<tc>, window_params = [{transform_indices = @transform_0, window_bounds = array<i64: 16, 32>}, {pipeline_mode = #tpu.pipeline_mode<synchronous>, transform_indices = @transform_1, window_bounds = array<i64: 1, 32>}, {transform_indices = @transform_2, window_bounds = array<i64: 16, 32>}]} {
    %c0 = arith.constant 0 : index
    %c0_0 = arith.constant 0 : index
    %0 = vector.load %arg1[%c0, %c0_0] : memref<16x32xf32, #tpu.memory_space<vmem>>, vector<16x32xf32>
    %1 = arith.mulf %0, %0 : vector<16x32xf32>
    %cst = arith.constant dense<0.000000e+00> : vector<16xf32>
    %2 = vector.multi_reduction <add>, %1, %cst [1] : vector<16x32xf32> to vector<16xf32>
    %3 = vector.shape_cast %2 : vector<16xf32> to vector<16x1xf32>
    %cst_1 = arith.constant 3.200000e+01 : f32
    %4 = vector.broadcast %cst_1 : f32 to vector<16x1xf32>
    %5 = arith.divf %3, %4 : vector<16x1xf32>
    %cst_2 = arith.constant 9.99999974E-6 : f32
    %6 = vector.broadcast %cst_2 : f32 to vector<16x1xf32>
    %7 = arith.addf %5, %6 : vector<16x1xf32>
    %8 = math.rsqrt %7 : vector<16x1xf32>
    %c0_3 = arith.constant 0 : index
    %c0_4 = arith.constant 0 : index
    %9 = vector.load %arg1[%c0_3, %c0_4] : memref<16x32xf32, #tpu.memory_space<vmem>>, vector<16x32xf32>
    %c0_5 = arith.constant 0 : index
    %c0_6 = arith.constant 0 : index
    %10 = vector.load %arg2[%c0_5, %c0_6] : memref<1x32xf32, #tpu.memory_space<vmem>>, vector<1x32xf32>
    %11 = vector.broadcast %8 : vector<16x1xf32> to vector<16x32xf32>
    %12 = arith.mulf %9, %11 : vector<16x32xf32>
    %13 = vector.broadcast %10 : vector<1x32xf32> to vector<16x32xf32>
    %14 = arith.mulf %13, %12 : vector<16x32xf32>
    %c0_7 = arith.constant 0 : index
    %c0_8 = arith.constant 0 : index
    %15 = vector.load %arg3[%c0_7, %c0_8] : memref<16x32xf32, #tpu.memory_space<vmem>>, vector<16x32xf32>
    tpu.vector_store %arg3[%c0_7, %c0_8], %14 {strides = array<i32>} : memref<16x32xf32, #tpu.memory_space<vmem>>, vector<16x32xf32>,
    return
  }
  func.func @transform_0(%arg0: i32) -> (i32, i32) {
    %c0_i32 = arith.constant 0 : i32
    %c0_i32_0 = arith.constant 0 : i32
    return %arg0, %c0_i32 : i32, i32
  }
  func.func @transform_1(%arg0: i32) -> (i32, i32) {
    %c0_i32 = arith.constant 0 : i32
    %c0_i32_0 = arith.constant 0 : i32
    %c0_i32_1 = arith.constant 0 : i32
    return %c0_i32, %c0_i32_0 : i32, i32
  }
  func.func @transform_2(%arg0: i32) -> (i32, i32) {
    %c0_i32 = arith.constant 0 : i32
    %c0_i32_0 = arith.constant 0 : i32
    return %arg0, %c0_i32 : i32, i32
  }
}

</mosaic_0001>

<bundles_post_ra>
// kernel: tpu_custom_call.1
= control target key start
LH: loop header
LB: loop body
LE: loop exit
PB: predicated region body
PF: predicated region fallthrough
CT: control target
= control target key end

     0   :  { %7 = vsyncpa [#allocation3], 0  ;;  %s187_s0 = inlined_call_operand.hbm [shape: f32[16,32], index: 0, kind: input, shape index: {}]   ;;  %s188_s1 = inlined_call_operand.vmem [shape: f32[1,32], index: 1, kind: input, shape index: {}]   ;;  %s189_s2 = inlined_call_operand.hbm [shape: f32[16,32], index: 2, kind: output, shape index: {}]  }
   0x1   :  { %8 = vsyncpa [#allocation4], 0  ;;  %s131_s9 = smov [#allocation2]   ;;  %s83_s13 = scalar_lea.hbm %s187_s0, 256 }
   0x2   :  { %s14_s10 = sshll.u32 %s131_s9, 4  ;;  %p84_p0 = scmp.ne.s32.totalorder %s187_s0, %s83_s13  ;;  %s15_s10 = int_to_ptr.vmem [resolvable:$true] %s14_s10 }
   0x3   :  { %p87_p1 = scmp.lt.u32.totalorder %s83_s13, %s187_s0 }
   0x5   :  { %p89_p2 = pnand %p87_p1, %p84_p0 }
   0x7   :  { %92 = shalt.err (!%p89_p2)
}
   0x8   :  { %s93_s18 = scalar_lea.vmem %s15_s10, 256  ;;  %p98_p4 = scmp.lt.s32.totalorder %s15_s10, %s15_s10 }
   0x9   :  { %p94_p3 = scmp.ne.s32.totalorder %s15_s10, %s93_s18  ;;  %p99_p5 = scmp.lt.s32.totalorder %s93_s18, %s93_s18 }
   0xb   :  { %p100_p6 = por %p99_p5, %p98_p4 }
   0xd   :  { %p101_p7 = pnand %p100_p6, %p94_p3 }
   0xf   :  { %104 = shalt.err (!%p101_p7)
}
  0x10   :  { %s132_s19 = smov 128   ;;  %s133_s20 = smov 8  }
  0x11   :  { %20 = dma.hbm_to_vmem [thread:$0]  %s187_s0, 256, %s15_s10, [#allocation3], %s132_s19, %s132_s19, %s133_s20  }
  0x12   :  { %127 = dma.done.wait [#allocation3], 256  }
  0x13   :  { %128 = vsyncadd [#allocation3], 4294967040  ;;  %v26_v0 = vld [vmem:[#allocation2] sm:$0xff]  ;;  %vm30_vm0 = vcmask 261120   ;;  %v27_v1 = vld [vmem:[#allocation2 + $0x8] sm:$0xff]  ;;  %s134_s24 = smov [#allocation5]  }
  0x14   :  { %v28_v2 = vmul.f32 %v26_v0, %v26_v0  ;;  %v29_v3 = vmul.f32 %v27_v1, %v27_v1  ;;  %v74_v13 = vld [vmem:[%s188_s1] ss:$0 sm:$0xff]  ;;  %s62_s25 = sshll.u32 %s134_s24, 4  ;;  %s63_s25 = int_to_ptr.vmem [resolvable:$true] %s62_s25 }
  0x15   :  { %s105_s26 = scalar_lea.vmem %s63_s25, 256  ;;  %p110_p9 = scmp.lt.s32.totalorder %s63_s25, %s63_s25 }
  0x16   :  { %v31_v4 = vsel %vm30_vm0, %v28_v2, 0.0  ;;  %v34_v5 = vsel %vm30_vm0, %v29_v3, 0.0  ;;  %p106_p8 = scmp.ne.s32.totalorder %s63_s25, %s105_s26  ;;  %p111_p10 = scmp.lt.s32.totalorder %s105_s26, %s105_s26 }
  0x17   :  { %32 = vadd.xlane.f32.xlu0 %v31_v4 }
  0x18   :  { %p112_p11 = por %p111_p10, %p110_p9 }
  0x1a   :  { %p113_p12 = pnand %p112_p11, %p106_p8 }
  0x1b   :  { %35 = vadd.xlane.f32.xlu0 %v34_v5 }
  0xa4   :  { %v33_v6 = vpop.xlane.xlu0 %32 }
  0xa5   :  { %v38_v7 = vmul.f32 0.03125, %v33_v6 }
  0xa7   :  { %v40_v8 = vadd.f32 1e-05, %v38_v7 }
  0xa8   :  { %v36_v9 = vpop.xlane.xlu0 %35 }
  0xa9   :  { %79 = vrsqrt.f32 %v40_v8  ;;  %v39_v10 = vmul.f32 0.03125, %v36_v9 }
  0xab   :  { %v41_v11 = vadd.f32 1e-05, %v39_v10 }
  0xad   :  { %81 = vrsqrt.f32 %v41_v11 }
  0xb3   :  { %v80_v12 = vpop.eup %79 }
  0xb4   :  { %v45_v14 = vmul.f32 %v80_v12, %v26_v0 }
  0xb6   :  { %v53_v15 = vmul.f32 %v74_v13, %v45_v14 }
  0xb7   :  { %v82_v16 = vpop.eup %81 }
  0xb8   :  { %v46_v17 = vmul.f32 %v82_v16, %v27_v1  ;;  %55 = vst.msk [vmem:[#allocation5] sm:$0xff] %vm30_vm0, %v53_v15 }
  0xba   :  { %v54_v18 = vmul.f32 %v74_v13, %v46_v17 }
  0xbc   :  { %56 = vst.msk [vmem:[#allocation5 + $0x8] sm:$0xff] %vm30_vm0, %v54_v18 }
  0xbd   :  { %116 = shalt.err (!%p113_p12)
}
  0xbe   :  { %s117_s28 = scalar_lea.hbm %s189_s2, 256 }
  0xbf   :  { %p118_p13 = scmp.ne.s32.totalorder %s189_s2, %s117_s28  ;;  %p121_p0 = scmp.lt.u32.totalorder %s117_s28, %s189_s2 }
  0xc1   :  { %p123_p1 = pnand %p121_p0, %p118_p13 }
  0xc3   :  { %126 = shalt.err (!%p123_p1)
}
  0xc4   :  { %68 = dma.vmem_to_hbm [thread:$0]  %s63_s25, 256, %s189_s2, [#allocation4], %s132_s19, %s132_s19, %s133_s20  }
  0xc5   :  { %129 = dma.done.wait [#allocation4], 256  }
  0xc6   :  { %130 = vsyncadd [#allocation4], 4294967040 }
  0xc7   :  { %72 = vsyncpa [#allocation3], 1 }
  0xc8   :  { %73 = vsyncpa [#allocation4], 1 }

</bundles_post_ra>
